<compile_context>
chip_gen: v7x
topology: tpu7x:2x2x1
jax: 0.10.0
libtpu: 0.0.40
codegen_flags: <defaults>
</compile_context>

<pallas_src>
import functools
import numpy as np
import jax
import jax.numpy as jnp
from jax.experimental import pallas as pl
from jax.experimental.pallas import tpu as pltpu

NEG_INF = -1e30   # finite "minus infinity" used to mask invalid lanes / rows


def _round_up(x, m):
    return ((x + m - 1) // m) * m


# ---------------------------------------------------------------------------
# Pallas kernel: sum_n [ logsumexp(logits[n, :]) - logits[n, target[n]] ]
# (per row block partial sum; wrapper reduces across row blocks)
# ---------------------------------------------------------------------------
def _ce_sum_kernel(logits_ref, tgt_ref, out_ref, m_sc, l_sc, t_sc, *, n, v, tm, tv):
    i = pl.program_id(0)            # row block (parallel)
    j = pl.program_id(1)            # vocab block (reduction axis)
    n_j = pl.num_programs(1)

    @pl.when(j == 0)
    def _():
        m_sc[...] = jnp.full_like(m_sc, NEG_INF)
        l_sc[...] = jnp.zeros_like(l_sc)
        t_sc[...] = jnp.zeros_like(t_sc)

    x = logits_ref[...].astype(jnp.float32)     # (TM, TV), upcast per tile
    col = jax.lax.broadcasted_iota(jnp.int32, x.shape, 1)

    # Ragged-edge masking is only compiled in when needed (n, v, tm, tv static).
    ragged_v = (v % tv) != 0
    ragged_n = (n % tm) != 0
    if ragged_v or ragged_n:
        ok = None
        if ragged_v:
            ok = col < (v - j * tv)
        if ragged_n:
            row_ok = (jax.lax.broadcasted_iota(jnp.int32, x.shape, 0) + i * tm) < n
            ok = row_ok if ok is None else (ok & row_ok)
        x = jnp.where(ok, x, NEG_INF)

    # Online logsumexp over the vocab axis.
    m_new = jnp.maximum(m_sc[...], jnp.max(x, axis=-1, keepdims=True))
    l_sc[...] = jnp.exp(m_sc[...] - m_new) * l_sc[...] + \
        jnp.sum(jnp.exp(x - m_new), axis=-1, keepdims=True)

    # Per-row target logit restricted to this vocab block: compare the static
    # lane iota against the *local* target (tgt - j*tv) — no full-tile iota add.
    local_tgt = tgt_ref[...] - j * tv           # (TM, 1) int32
    t_sc[...] += jnp.sum(jnp.where(col == local_tgt, x, 0.0), axis=-1, keepdims=True)
    m_sc[...] = m_new

    @pl.when(j == n_j - 1)
    def _():
        loss_rows = m_sc[...] + jnp.log(l_sc[...]) - t_sc[...]     # (TM, 1)
        if ragged_n:
            row = jax.lax.broadcasted_iota(jnp.int32, loss_rows.shape, 0)
            loss_rows = jnp.where((i * tm + row) < n, loss_rows, 0.0)
        total = jnp.sum(loss_rows, keepdims=True)                  # (1, 1)
        # Lane-dense, unmasked (8,128) store of the row-block partial sum.
        out_ref[...] = jnp.broadcast_to(total, out_ref.shape)


def cross_entropy_sum(logits, targets):
    """Sum-reduced cross entropy. logits: (N, V) any float dtype, targets: (N,) int."""
    n, v = logits.shape
    targets = targets.astype(jnp.int32).reshape(n, 1)

    # Tile sizes: lane-aligned vocab tile up to 4096, row tile sized so one f32
    # logits tile is ~4 MiB (v7x-safe double-buffered, amortizes per-step cost).
    tv = min(_round_up(v, 128), 4096)
    tm_cap = max(8, ((1 << 20) // tv) // 8 * 8)
    tm = min(_round_up(n, 8), tm_cap, 1024)

    grid = (pl.cdiv(n, tm), pl.cdiv(v, tv))
    n_row_blocks = grid[0]

    kernel = functools.partial(_ce_sum_kernel, n=n, v=v, tm=tm, tv=tv)

    out = pl.pallas_call(
        kernel,
        out_shape=jax.ShapeDtypeStruct((n_row_blocks, 8, 128), jnp.float32),
        grid=grid,
        in_specs=[pl.BlockSpec((tm, tv), lambda i, j: (i, j)),
                  pl.BlockSpec((tm, 1), lambda i, j: (i, 0))],
        out_specs=pl.BlockSpec((1, 8, 128), lambda i, j: (i, 0, 0)),
        scratch_shapes=[pltpu.VMEM((tm, 1), jnp.float32),   # running max
                        pltpu.VMEM((tm, 1), jnp.float32),   # running sumexp
                        pltpu.VMEM((tm, 1), jnp.float32)],  # target logit
        compiler_params=pltpu.CompilerParams(
            dimension_semantics=("parallel", "arbitrary"),
            vmem_limit_bytes=48 * 1024 * 1024),
    )(logits, targets)

    # Tiny final reduction over row-block partials (each partial is replicated
    # across its (8,128) block; read one lane per block).
    return jnp.sum(out[:, 0, 0])


# ---------------------------------------------------------------------------
# AdaptiveLoss forward (device-side glue around the Pallas CE kernel).
# ---------------------------------------------------------------------------
def remap_head_target(target, cutoff):
    """Targets in tail bin i are replaced by the head id cutoff[0] + i."""
    head = target
    for i in range(len(cutoff) - 1):
        mask = (target >= cutoff[i]) & (target < cutoff[i + 1])
        head = jnp.where(mask, cutoff[0] + i, head)
    return head


def _tail_targets(target, n_rows, lo, hi):
    """target[mask] - lo as a static-length (n_rows,) array, order preserving,
    computed fully on device (no host sync). n_rows comes from the tail bin's
    logits shape, exactly as the PyTorch AdaptiveSoftmax front-end guarantees."""
    mask = (target >= lo) & (target < hi)
    pos = jnp.cumsum(mask.astype(jnp.int32)) - 1
    dst = jnp.where(mask, pos, n_rows)           # unmasked rows scatter OOB -> dropped
    return jnp.zeros((n_rows,), jnp.int32).at[dst].set(
        (target - lo).astype(jnp.int32), mode="drop")


def adaptive_loss_forward(inputs, target, cutoff):
    """inputs: [head_logits, tail_logits_1 or None, ...]; target: (B,) int."""
    batch_size = inputs[0].shape[0]
    target = target.astype(jnp.int32)

    # Head bin: full batch, remapped targets.
    total = cross_entropy_sum(inputs[0], remap_head_target(target, cutoff))

    # TODO(synk): the per-bin CE kernels could be fused into one pallas_call via
    # PrefetchScalarGridSpec, but each bin has a different vocab width (block
    # shape); they stay as separate, host-sync-free device dispatches here.
    for i in range(len(cutoff) - 1):
        if inputs[i + 1] is None:
            continue
        n_i = inputs[i + 1].shape[0]
        tail_tgt = _tail_targets(target, n_i, cutoff[i], cutoff[i + 1])
        total = total + cross_entropy_sum(inputs[i + 1], tail_tgt)

    return total / batch_size


if __name__ == "__main__":
    # Small shapes consistent with the module: 16-token shortlist + two tail bins.
    cutoff = [16, 32, 64]
    batch = 16

    key = jax.random.PRNGKey(0)
    k_tgt, k_head, k_t1, k_t2 = jax.random.split(key, 4)

    target = jax.random.randint(k_tgt, (batch,), 0, cutoff[-1], jnp.int32)
    target_np = np.asarray(target)   # host copy only for test-input construction

    # Head logits: shortlist tokens + one slot per tail cluster.
    head_dim = cutoff[0] + len(cutoff) - 1
    inputs = [jax.random.normal(k_head, (batch, head_dim), jnp.float32)]

    # Tail logits: only rows whose target falls in the bin (as an AdaptiveSoftmax
    # front-end would produce); None if the bin is empty for this batch.
    for i, k in zip(range(len(cutoff) - 1), (k_t1, k_t2)):
        n_i = int(((target_np >= cutoff[i]) & (target_np < cutoff[i + 1])).sum())
        if n_i > 0:
            inputs.append(
                jax.random.normal(k, (n_i, cutoff[i + 1] - cutoff[i]), jnp.float32))
        else:
            inputs.append(None)

    loss = adaptive_loss_forward(inputs, target, cutoff)
    loss = jax.block_until_ready(loss)

    # Pure-JAX reference (same math, no Pallas) to sanity-check the kernel.
    def ce_sum_ref(logits, tgt):
        logp = jax.nn.log_softmax(logits.astype(jnp.float32), axis=-1)
        return -jnp.sum(jnp.take_along_axis(logp, tgt[:, None].astype(jnp.int32), axis=-1))

    ref = ce_sum_ref(inputs[0], remap_head_target(target, cutoff))
    for i in range(len(cutoff) - 1):
        if inputs[i + 1] is None:
            continue
        mask = (target_np >= cutoff[i]) & (target_np < cutoff[i + 1])
        ref = ref + ce_sum_ref(inputs[i + 1],
                               jnp.asarray(target_np[mask] - cutoff[i], jnp.int32))
    ref = ref / batch

    assert loss.shape == ()
    assert bool(jnp.isfinite(loss))
    assert abs(float(loss) - float(ref)) <= 1e-3 + 1e-3 * abs(float(ref)), \
        (float(loss), float(ref))
    print("KERNEL_OK")
</pallas_src>

<mosaic_0001>
module attributes {stable_mosaic.version = 11 : i64} {
  func.func @_ce_sum_kernel(%arg0: i32, %arg1: i32, %arg2: memref<16x128xf32, #tpu.memory_space<vmem>>, %arg3: memref<16x1xi32, #tpu.memory_space<vmem>>, %arg4: memref<1x8x128xf32, #tpu.memory_space<vmem>>, %arg5: memref<16x1xf32, #tpu.memory_space<vmem>>, %arg6: memref<16x1xf32, #tpu.memory_space<vmem>>, %arg7: memref<16x1xf32, #tpu.memory_space<vmem>>) attributes {dimension_semantics = [#tpu.dimension_semantics<parallel>, #tpu.dimension_semantics<arbitrary>], iteration_bounds = array<i64: 1, 1>, scalar_prefetch = 0 : i64, scratch_operands = 3 : i64, tpu.core_type = #tpu.core_type<tc>, window_params = [{transform_indices = @transform_0, window_bounds = array<i64: 16, 128>}, {transform_indices = @transform_1, window_bounds = array<i64: 16, 1>}, {transform_indices = @transform_2, window_bounds = array<i64: 1, 8, 128>}]} {
    %c0_i32 = arith.constant 0 : i32
    %0 = arith.cmpi eq, %arg1, %c0_i32 : i32
    %1 = arith.extui %0 : i1 to i32
    %c0_i32_0 = arith.constant 0 : i32
    %2 = arith.cmpi ne, %1, %c0_i32_0 : i32
    scf.if %2 {
      %cst_25 = arith.constant -1.000000e+30 : f32
      %44 = vector.broadcast %cst_25 : f32 to vector<16x1xf32>
      %c0_26 = arith.constant 0 : index
      %c0_27 = arith.constant 0 : index
      %45 = vector.load %arg5[%c0_26, %c0_27] : memref<16x1xf32, #tpu.memory_space<vmem>>, vector<16x1xf32>
      tpu.vector_store %arg5[%c0_26, %c0_27], %44 {strides = array<i32>} : memref<16x1xf32, #tpu.memory_space<vmem>>, vector<16x1xf32>,
      %cst_28 = arith.constant 0.000000e+00 : f32
      %46 = vector.broadcast %cst_28 : f32 to vector<16x1xf32>
      %c0_29 = arith.constant 0 : index
      %c0_30 = arith.constant 0 : index
      %47 = vector.load %arg6[%c0_29, %c0_30] : memref<16x1xf32, #tpu.memory_space<vmem>>, vector<16x1xf32>
      tpu.vector_store %arg6[%c0_29, %c0_30], %46 {strides = array<i32>} : memref<16x1xf32, #tpu.memory_space<vmem>>, vector<16x1xf32>,
      %cst_31 = arith.constant 0.000000e+00 : f32
      %48 = vector.broadcast %cst_31 : f32 to vector<16x1xf32>
      %c0_32 = arith.constant 0 : index
      %c0_33 = arith.constant 0 : index
      %49 = vector.load %arg7[%c0_32, %c0_33] : memref<16x1xf32, #tpu.memory_space<vmem>>, vector<16x1xf32>
      tpu.vector_store %arg7[%c0_32, %c0_33], %48 {strides = array<i32>} : memref<16x1xf32, #tpu.memory_space<vmem>>, vector<16x1xf32>,
    } else {
    }
    %c0 = arith.constant 0 : index
    %c0_1 = arith.constant 0 : index
    %3 = vector.load %arg2[%c0, %c0_1] : memref<16x128xf32, #tpu.memory_space<vmem>>, vector<16x128xf32>
    %4 = tpu.iota {dimensions = array<i32: 1>} : vector<16x128xi32>
    %c128_i32 = arith.constant 128 : i32
    %5 = arith.muli %arg1, %c128_i32 : i32
    %c18_i32 = arith.constant 18 : i32
    %6 = arith.subi %c18_i32, %5 : i32
    %7 = vector.broadcast %6 : i32 to vector<16x128xi32>
    %8 = arith.cmpi slt, %4, %7 : vector<16x128xi32>
    %cst = arith.constant -1.000000e+30 : f32
    %9 = vector.broadcast %cst : f32 to vector<16x128xf32>
    %10 = arith.select %8, %3, %9 : vector<16x128xi1>, vector<16x128xf32>
    %c0_2 = arith.constant 0 : index
    %c0_3 = arith.constant 0 : index
    %11 = vector.load %arg5[%c0_2, %c0_3] : memref<16x1xf32, #tpu.memory_space<vmem>>, vector<16x1xf32>
    %cst_4 = arith.constant dense<0xFF800000> : vector<16xf32>
    %12 = vector.multi_reduction <maximumf>, %10, %cst_4 [1] : vector<16x128xf32> to vector<16xf32>
    %13 = vector.shape_cast %12 : vector<16xf32> to vector<16x1xf32>
    %14 = arith.maximumf %11, %13 : vector<16x1xf32>
    %c0_5 = arith.constant 0 : index
    %c0_6 = arith.constant 0 : index
    %15 = vector.load %arg5[%c0_5, %c0_6] : memref<16x1xf32, #tpu.memory_space<vmem>>, vector<16x1xf32>
    %16 = arith.subf %15, %14 : vector<16x1xf32>
    %17 = math.exp %16 : vector<16x1xf32>
    %c0_7 = arith.constant 0 : index
    %c0_8 = arith.constant 0 : index
    %18 = vector.load %arg6[%c0_7, %c0_8] : memref<16x1xf32, #tpu.memory_space<vmem>>, vector<16x1xf32>
    %19 = arith.mulf %17, %18 : vector<16x1xf32>
    %20 = vector.broadcast %14 : vector<16x1xf32> to vector<16x128xf32>
    %21 = arith.subf %10, %20 : vector<16x128xf32>
    %22 = math.exp %21 : vector<16x128xf32>
    %cst_9 = arith.constant dense<0.000000e+00> : vector<16xf32>
    %23 = vector.multi_reduction <add>, %22, %cst_9 [1] : vector<16x128xf32> to vector<16xf32>
    %24 = vector.shape_cast %23 : vector<16xf32> to vector<16x1xf32>
    %25 = arith.addf %19, %24 : vector<16x1xf32>
    %c0_10 = arith.constant 0 : index
    %c0_11 = arith.constant 0 : index
    %26 = vector.load %arg6[%c0_10, %c0_11] : memref<16x1xf32, #tpu.memory_space<vmem>>, vector<16x1xf32>
    tpu.vector_store %arg6[%c0_10, %c0_11], %25 {strides = array<i32>} : memref<16x1xf32, #tpu.memory_space<vmem>>, vector<16x1xf32>,
    %c0_12 = arith.constant 0 : index
    %c0_13 = arith.constant 0 : index
    %27 = vector.load %arg3[%c0_12, %c0_13] : memref<16x1xi32, #tpu.memory_space<vmem>>, vector<16x1xi32>
    %c128_i32_14 = arith.constant 128 : i32
    %28 = arith.muli %arg1, %c128_i32_14 : i32
    %29 = vector.broadcast %28 : i32 to vector<16x1xi32>
    %30 = arith.subi %27, %29 : vector<16x1xi32>
    %c0_15 = arith.constant 0 : index
    %c0_16 = arith.constant 0 : index
    %31 = vector.load %arg7[%c0_15, %c0_16] : memref<16x1xf32, #tpu.memory_space<vmem>>, vector<16x1xf32>
    %32 = vector.broadcast %30 : vector<16x1xi32> to vector<16x128xi32>
    %33 = arith.cmpi eq, %4, %32 : vector<16x128xi32>
    %cst_17 = arith.constant 0.000000e+00 : f32
    %34 = vector.broadcast %cst_17 : f32 to vector<16x128xf32>
    %35 = arith.select %33, %10, %34 : vector<16x128xi1>, vector<16x128xf32>
    %cst_18 = arith.constant dense<0.000000e+00> : vector<16xf32>
    %36 = vector.multi_reduction <add>, %35, %cst_18 [1] : vector<16x128xf32> to vector<16xf32>
    %37 = vector.shape_cast %36 : vector<16xf32> to vector<16x1xf32>
    %38 = arith.addf %31, %37 : vector<16x1xf32>
    %c0_19 = arith.constant 0 : index
    %c0_20 = arith.constant 0 : index
    %39 = vector.load %arg7[%c0_19, %c0_20] : memref<16x1xf32, #tpu.memory_space<vmem>>, vector<16x1xf32>
    tpu.vector_store %arg7[%c0_19, %c0_20], %38 {strides = array<i32>} : memref<16x1xf32, #tpu.memory_space<vmem>>, vector<16x1xf32>,
    %c0_21 = arith.constant 0 : index
    %c0_22 = arith.constant 0 : index
    %40 = vector.load %arg5[%c0_21, %c0_22] : memref<16x1xf32, #tpu.memory_space<vmem>>, vector<16x1xf32>
    tpu.vector_store %arg5[%c0_21, %c0_22], %14 {strides = array<i32>} : memref<16x1xf32, #tpu.memory_space<vmem>>, vector<16x1xf32>,
    %c0_i32_23 = arith.constant 0 : i32
    %41 = arith.cmpi eq, %arg1, %c0_i32_23 : i32
    %42 = arith.extui %41 : i1 to i32
    %c0_i32_24 = arith.constant 0 : i32
    %43 = arith.cmpi ne, %42, %c0_i32_24 : i32
    scf.if %43 {
      %c0_25 = arith.constant 0 : index
      %c0_26 = arith.constant 0 : index
      %44 = vector.load %arg5[%c0_25, %c0_26] : memref<16x1xf32, #tpu.memory_space<vmem>>, vector<16x1xf32>
      %c0_27 = arith.constant 0 : index
      %c0_28 = arith.constant 0 : index
      %45 = vector.load %arg6[%c0_27, %c0_28] : memref<16x1xf32, #tpu.memory_space<vmem>>, vector<16x1xf32>
      %46 = math.log %45 : vector<16x1xf32>
      %47 = arith.addf %44, %46 : vector<16x1xf32>
      %c0_29 = arith.constant 0 : index
      %c0_30 = arith.constant 0 : index
      %48 = vector.load %arg7[%c0_29, %c0_30] : memref<16x1xf32, #tpu.memory_space<vmem>>, vector<16x1xf32>
      %49 = arith.subf %47, %48 : vector<16x1xf32>
      %50 = vector.shape_cast %49 : vector<16x1xf32> to vector<1x16x1xf32>
      %cst_31 = arith.constant dense<0.000000e+00> : vector<1xf32>
      %51 = vector.multi_reduction <add>, %50, %cst_31 [1, 2] : vector<1x16x1xf32> to vector<1xf32>
      %52 = vector.shape_cast %51 : vector<1xf32> to vector<1x1x1xf32>
      %53 = vector.extract %52[0, 0, 0] : f32 from vector<1x1x1xf32>
      %54 = vector.broadcast %53 : f32 to vector<1x1xf32>
      %55 = vector.shape_cast %54 : vector<1x1xf32> to vector<1x1x1xf32>
      %56 = vector.broadcast %55 : vector<1x1x1xf32> to vector<1x8x128xf32>
      %c0_32 = arith.constant 0 : index
      %c0_33 = arith.constant 0 : index
      %c0_34 = arith.constant 0 : index
      %57 = vector.load %arg4[%c0_32, %c0_33, %c0_34] : memref<1x8x128xf32, #tpu.memory_space<vmem>>, vector<1x8x128xf32>
      tpu.vector_store %arg4[%c0_32, %c0_33, %c0_34], %56 {strides = array<i32>} : memref<1x8x128xf32, #tpu.memory_space<vmem>>, vector<1x8x128xf32>,
    } else {
    }
    return
  }
  func.func @transform_0(%arg0: i32, %arg1: i32) -> (i32, i32) {
    %c0_i32 = arith.constant 0 : i32
    return %arg0, %arg1 : i32, i32
  }
  func.func @transform_1(%arg0: i32, %arg1: i32) -> (i32, i32) {
    %c0_i32 = arith.constant 0 : i32
    %c0_i32_0 = arith.constant 0 : i32
    return %arg0, %c0_i32 : i32, i32
  }
  func.func @transform_2(%arg0: i32, %arg1: i32) -> (i32, i32, i32) {
    %c0_i32 = arith.constant 0 : i32
    %c0_i32_0 = arith.constant 0 : i32
    %c0_i32_1 = arith.constant 0 : i32
    return %arg0, %c0_i32, %c0_i32_0 : i32, i32, i32
  }
}

</mosaic_0001>

<bundles_post_ra>
// kernel: tpu_custom_call.1
= control target key start
LH: loop header
LB: loop body
LE: loop exit
PB: predicated region body
PF: predicated region fallthrough
CT: control target
= control target key end

     0   :  { %v25_v0 = vlaneseq  ;;  %s249_s0 = inlined_call_operand.vmem [shape: f32[16,18], index: 0, kind: input, shape index: {}]   ;;  %s250_s1 = inlined_call_operand.vmem [shape: s32[16,1], index: 1, kind: input, shape index: {}]   ;;  %s251_s2 = inlined_call_operand.hbm [shape: f32[1,8,128], index: 2, kind: output, shape index: {}]  }
   0x1   :  { %7 = vsyncpa [#allocation6], 0  ;;  %v23_v1 = vld [vmem:[%s249_s0] sm:$0xff]  ;;  %v24_v3 = vld [vmem:[%s249_s0 + $0x8] sm:$0xff]  ;;  %vm16_vm1 = vcmask 7168   ;;  %v193_v7 = vmov 0  }
   0x2   :  { %v26_v2 = vand.u32 127, %v25_v0  ;;  %v192_v6 = vmov -1e+30   ;;  %154 = vset.pattern.permute.xlu1 %v193_v7  ;;  %155 = vset.pattern.permute.xlu0 %v193_v7  ;;  %v194_v8 = vmov 0.0   ;;  %v76_v9 = vld [vmem:[%s250_s1] sm:$0xff]  ;;  %v77_v18 = vld [vmem:[%s250_s1 + $0x8] sm:$0xff] }
   0x3   :  { %17 = vst.msk [vmem:[#allocation2] sm:$0xff] %vm16_vm1, %v192_v6  ;;  %18 = vst.msk [vmem:[#allocation2 + $0x8] sm:$0xff] %vm16_vm1, %v192_v6  ;;  %s195_s1 = smov [#allocation5]  }
   0x4   :  { %vm30_vm0 = vcmp.lt.s32.totalorder %v26_v2, 18  ;;  %19 = vst.msk [vmem:[#allocation3] sm:$0xff] %vm16_vm1, %v194_v8  ;;  %20 = vst.msk [vmem:[#allocation3 + $0x8] sm:$0xff] %vm16_vm1, %v194_v8  ;;  %s140_s16 = sshll.u32 %s195_s1, 4  ;;  %s141_s16 = int_to_ptr.vmem [resolvable:$true] %s140_s16 }
   0x5   :  { %v31_v4 = vsel %vm30_vm0, %v23_v1, -1e+30  ;;  %v32_v5 = vsel %vm30_vm0, %v24_v3, -1e+30  ;;  %21 = vst.msk [vmem:[#allocation4] sm:$0xff] %vm16_vm1, %v194_v8  ;;  %22 = vst.msk [vmem:[#allocation4 + $0x8] sm:$0xff] %vm16_vm1, %v194_v8  ;;  %p173_p1 = scmp.lt.s32.totalorder %s141_s16, %s141_s16 }
   0x6   :  { %35 = vmax.xlane.f32.xlu0 %v31_v4  ;;  %s168_s18 = scalar_lea.vmem %s141_s16, 128 }
   0x7   :  { %p169_p0 = scmp.ne.s32.totalorder %s141_s16, %s168_s18  ;;  %p174_p2 = scmp.lt.s32.totalorder %s168_s18, %s168_s18 }
   0x9   :  { %p175_p3 = por %p174_p2, %p173_p1 }
   0xa   :  { %37 = vmax.xlane.f32.xlu0 %v32_v5  ;;  %v33_v10 = vld [vmem:[#allocation2] sm:$0xff]  ;;  %v34_v13 = vld [vmem:[#allocation2 + $0x8] sm:$0xff] }
   0xb   :  { %v47_v37 = vld [vmem:[#allocation3] sm:$0xff]  ;;  %v48_v41 = vld [vmem:[#allocation3 + $0x8] sm:$0xff]  ;;  %p176_p4 = pnand %p175_p3, %p169_p0 }
   0xc   :  { %v81_v32 = vld [vmem:[#allocation4] sm:$0xff]  ;;  %v82_v46 = vld [vmem:[#allocation4 + $0x8] sm:$0xff] }
  0x20   :  { %84 = vperm.xlu0 %155, %v76_v9  }
  0x93   :  { %v36_v11 = vpop.xlane.xlu0 %35 }
  0x94   :  { %v39_v12 = vmax.f32 %v33_v10, %v36_v11 }
  0x96   :  { %v41_v14 = vsub.f32 %v33_v10, %v39_v12  ;;  %101 = vst.msk [vmem:[#allocation2] sm:$0xff] %vm16_vm1, %v39_v12  ;;  %53 = vperm.xlu1 %154, %v39_v12  }
  0x97   :  { %v38_v15 = vpop.xlane.xlu0 %37 }
  0x98   :  { %v40_v16 = vmax.f32 %v34_v13, %v38_v15  ;;  %v43_v34 = vmul.f32 1.442695, %v41_v14 }
  0x9a   :  { %v42_v17 = vsub.f32 %v34_v13, %v40_v16  ;;  %102 = vst.msk [vmem:[#allocation2 + $0x8] sm:$0xff] %vm16_vm1, %v40_v16  ;;  %58 = vperm.xlu1 %154, %v40_v16  }
  0x9c   :  { %v45_v35 = vmul.f32 1.442695, %v42_v17 }
  0x9d   :  { %v106_v53 = vld [vmem:[#allocation2] sm:$0xff] }
  0x9e   :  { %87 = vperm.xlu1 %154, %v77_v18  }
  0x9f   :  { %v85_v19 = vpop.permute.xlu0 %84 }
  0xa0   :  { %vm89_vm2 = vcmp.eq.s32.totalorder %v26_v2, %v85_v19 }
  0xa1   :  { %v91_v20 = vsel %vm89_vm2, %v31_v4, 0.0  ;;  %v107_v58 = vld [vmem:[#allocation2 + $0x8] sm:$0xff] }
  0xa2   :  { %93 = vadd.xlane.f32.xlu0 %v91_v20 }
 0x115   :  { %v54_v21 = vpop.permute.xlu1 %53 }
 0x116   :  { %v61_v22 = vsub.f32 %v31_v4, %v54_v21 }
 0x118   :  { %v63_v23 = vmul.f32 1.442695, %v61_v22 }
 0x119   :  { %v59_v24 = vpop.permute.xlu1 %58 }
 0x11a   :  { %156 = vpow2.f32 %v63_v23  ;;  %v62_v25 = vsub.f32 %v32_v5, %v59_v24 }
 0x11c   :  { %v65_v26 = vmul.f32 1.442695, %v62_v25 }
 0x11d   :  { %v88_v28 = vpop.permute.xlu1 %87 }
 0x11e   :  { %158 = vpow2.f32 %v65_v26  ;;  %vm90_vm3 = vcmp.eq.s32.totalorder %v26_v2, %v88_v28 }
 0x11f   :  { %v92_v30 = vsel %vm90_vm3, %v32_v5, 0.0  ;;  %160 = vpow2.f32 %v43_v34 }
 0x120   :  { %162 = vpow2.f32 %v45_v35 }
 0x124   :  { %v157_v27 = vpop.eup %156 }
 0x125   :  { %67 = vadd.xlane.f32.xlu1 %v157_v27 }
 0x128   :  { %v159_v29 = vpop.eup %158 }
 0x129   :  { %69 = vadd.xlane.f32.xlu1 %v159_v29  ;;  %v161_v36 = vpop.eup %160 }
 0x12a   :  { %v49_v38 = vmul.f32 %v161_v36, %v47_v37  ;;  %v163_v39 = vpop.eup %162 }
 0x12b   :  { %v50_v43 = vmul.f32 %v163_v39, %v48_v41 }
 0x12d   :  { %95 = vadd.xlane.f32.xlu1 %v92_v30 }
 0x12f   :  { %v94_v31 = vpop.xlane.xlu0 %93 }
 0x130   :  { %v97_v33 = vadd.f32 %v94_v31, %v81_v32 }
 0x132   :  { %99 = vst.msk [vmem:[#allocation4] sm:$0xff] %vm16_vm1, %v97_v33 }
 0x139   :  { %v116_v56 = vld [vmem:[#allocation4] sm:$0xff] }
 0x1b2   :  { %v68_v40 = vpop.xlane.xlu1 %67 }
 0x1b3   :  { %v71_v42 = vadd.f32 %v68_v40, %v49_v38 }
 0x1b5   :  { %74 = vst.msk [vmem:[#allocation3] sm:$0xff] %vm16_vm1, %v71_v42 }
 0x1b6   :  { %v70_v44 = vpop.xlane.xlu1 %69 }
 0x1b7   :  { %v72_v45 = vadd.f32 %v70_v44, %v50_v43 }
 0x1b9   :  { %75 = vst.msk [vmem:[#allocation3 + $0x8] sm:$0xff] %vm16_vm1, %v72_v45 }
 0x1ba   :  { %v96_v47 = vpop.xlane.xlu1 %95 }
 0x1bb   :  { %v98_v48 = vadd.f32 %v96_v47, %v82_v46 }
 0x1bc   :  { %v108_v49 = vld [vmem:[#allocation3] sm:$0xff] }
 0x1bd   :  { %100 = vst.msk [vmem:[#allocation4 + $0x8] sm:$0xff] %vm16_vm1, %v98_v48  ;;  %164 = vlog2.f32 %v108_v49 }
 0x1c0   :  { %v109_v50 = vld [vmem:[#allocation3 + $0x8] sm:$0xff] }
 0x1c1   :  { %166 = vlog2.f32 %v109_v50 }
 0x1c4   :  { %v117_v61 = vld [vmem:[#allocation4 + $0x8] sm:$0xff] }
 0x1c7   :  { %v165_v51 = vpop.eup %164 }
 0x1c8   :  { %v111_v52 = vmul.f32 0.6931472, %v165_v51 }
 0x1ca   :  { %v114_v54 = vadd.f32 %v111_v52, %v106_v53 }
 0x1cb   :  { %v167_v55 = vpop.eup %166 }
 0x1cc   :  { %v113_v57 = vmul.f32 0.6931472, %v167_v55  ;;  %v118_v60 = vsub.f32 %v114_v54, %v116_v56 }
 0x1ce   :  { %v115_v59 = vadd.f32 %v113_v57, %v107_v58  ;;  %v120_v63 = vsel %vm16_vm1, %v118_v60, 0.0 }
 0x1d0   :  { %v119_v62 = vsub.f32 %v115_v59, %v117_v61 }
 0x1d2   :  { %v121_v0 = vsel %vm16_vm1, %v119_v62, 0.0 }
 0x1d3   :  { %v122_v1 = vadd.f32 %v121_v0, %v120_v63 }
 0x1d5   :  { %123 = vadd.xlane.f32.xlu1 %v122_v1 }
 0x262   :  { %v124_v2 = vpop.xlane.xlu1 %123 }
 0x263   :  { %v125_v3 = vrot.slane %v124_v2, 4 }
 0x265   :  { %v126_v4 = vadd.f32 %v125_v3, %v124_v2 }
 0x267   :  { %v127_v5 = vrot.slane %v126_v4, 2 }
 0x269   :  { %v128_v6 = vadd.f32 %v127_v5, %v126_v4 }
 0x26b   :  { %v129_v7 = vrot.slane %v128_v6, 1 }
 0x26d   :  { %v130_v8 = vadd.f32 %v129_v7, %v128_v6 }
 0x26f   :  { %148 = vpush %v130_v8 }
 0x2a0   :  { %s149_s17 = spop %148 }
 0x2a1   :  { %v132_v9 = vstv %s149_s17 }
 0x2a2   :  { %133 = vst [vmem:[#allocation5] sm:$0xff] %v132_v9 }
 0x2a3   :  { %179 = shalt.err (!%p176_p4)
}
 0x2a4   :  { %s180_s21 = scalar_lea.hbm %s251_s2, 128 }
 0x2a5   :  { %p181_p5 = scmp.ne.s32.totalorder %s251_s2, %s180_s21  ;;  %p184_p6 = scmp.lt.u32.totalorder %s180_s21, %s251_s2 }
 0x2a7   :  { %p186_p7 = pnand %p184_p6, %p181_p5 }
 0x2a9   :  { %189 = shalt.err (!%p186_p7)
}
 0x2aa   :  { %143 = dma.vmem_to_hbm [thread:$0]  %s141_s16, 128, %s251_s2, [#allocation6]  }
 0x2ab   :  { %190 = dma.done.wait [#allocation6], 128  }
 0x2ac   :  { %191 = vsyncadd [#allocation6], 4294967168 }
 0x2ad   :  { %147 = vsyncpa [#allocation6], 1 }

</bundles_post_ra>
